<compile_context>
chip_gen: v7x
topology: tpu7x:2x2x1
jax: 0.10.0
libtpu: 0.0.40
codegen_flags: <defaults>
</compile_context>

<pallas_src>
import math

import jax
import jax.numpy as jnp
from jax.experimental import pallas as pl
from jax.experimental.pallas import tpu as pltpu


# ----------------------------- helpers --------------------------------------

def _round_up(x: int, m: int) -> int:
    return ((x + m - 1) // m) * m


def _pad_to(x, shape):
    pads = [(0, s - d) for s, d in zip(shape, x.shape)]
    return jnp.pad(x, pads)


# ----------------------------- Pallas kernel --------------------------------

def time_embedding_kernel(t_ref,      # (tb, 1)   int32  timestep indices (VMEM tile)
                          tw1_ref,    # (Tp, Np)  f32    time_matrix @ W1 + b1 (resident)
                          w2_ref,     # (Np, Np)  f32    (resident)
                          b2_ref,     # (1, Np)   f32
                          out_ref):   # (tb, Np)  out dtype, lane-dense last dim
    tb = out_ref.shape[0]
    tp = tw1_ref.shape[0]

    # Fused gather + Linear(d_model, dim) + b1: one-hot matmul on the MXU.
    # (tw1 already contains W1 and b1; exactly one one-hot entry per row is 1.)
    iota = jax.lax.broadcasted_iota(jnp.int32, (tb, tp), 1)
    one_hot = (iota == t_ref[...]).astype(jnp.float32)           # (tb, Tp)
    h = jnp.dot(one_hot, tw1_ref[...], preferred_element_type=jnp.float32)

    # Swish in f32 (EUP path; v5e has no bf16 VPU/EUP).
    h = h * jax.nn.sigmoid(h)

    # Linear(dim, dim) + b2.
    o = jnp.dot(h, w2_ref[...], preferred_element_type=jnp.float32) + b2_ref[...]
    out_ref[...] = o.astype(out_ref.dtype)


# ----------------------------- wrapper ---------------------------------------

def time_embedding_forward(t, time_matrix, w1, b1, w2, b2, *,
                           block_b=256, out_dtype=jnp.float32):
    """TimeEmbedding.forward: fused one-hot gather + Linear -> Swish -> Linear.

    t:           (B,) int32 timestep indices (must satisfy 0 <= t < T)
    time_matrix: (T, d_model) f32 sinusoidal table
    w1: (d_model, dim), b1: (dim,), w2: (dim, dim), b2: (dim,)   (x @ W + b)
    returns (B, dim) `out_dtype`
    """
    B = t.shape[0]
    T, d_model = time_matrix.shape
    dim = w1.shape[1]

    tp = _round_up(T, 128)                 # lane-dense one-hot / contraction dim
    np_ = _round_up(dim, 128)              # lane-dense N / output lanes

    # Batch tiling: big tiles for the 256-wide MXU (v6e/v7x), but keep >= 2
    # grid steps when there are enough rows so "parallel" can shard across the
    # two TensorCores on v7x.
    b8 = _round_up(B, 8)
    tb = min(block_b, b8)
    if b8 >= 256:
        tb = min(tb, _round_up((b8 + 1) // 2, 8))
    bp = _round_up(b8, tb)
    grid = (bp // tb,)

    # Fold Linear(d_model, dim) + b1 into the table once per weight update
    # (O(T*d_model*dim), negligible). Zero-padded rows/cols preserve semantics:
    # rows >= T are never selected (t < T), padded output columns stay zero.
    tw1 = time_matrix.astype(jnp.float32) @ w1.astype(jnp.float32) \
        + b1.reshape(1, dim).astype(jnp.float32)
    tw1_p = _pad_to(tw1, (tp, np_))
    w2_p = _pad_to(w2.astype(jnp.float32), (np_, np_))
    b2_p = _pad_to(b2.reshape(1, dim).astype(jnp.float32), (1, np_))
    t_p = jnp.pad(t.astype(jnp.int32), (0, bp - B)).reshape(bp, 1)  # pad = index 0

    # VMEM budget: actual need (resident table/weights + double-buffered tiles)
    # plus ~4 MiB headroom; never request the full per-TC VMEM (64 MiB on v7x).
    nbytes = lambda a: int(a.size) * a.dtype.itemsize
    resident = nbytes(tw1_p) + nbytes(w2_p) + nbytes(b2_p)
    per_step = tb * np_ * jnp.dtype(out_dtype).itemsize + tb * 4    # out tile + t tile
    vmem_limit = int(min(max(2 * (resident + per_step) + (4 << 20), 8 << 20), 48 << 20))

    grid_spec = pltpu.PrefetchScalarGridSpec(
        num_scalar_prefetch=0,
        grid=grid,
        in_specs=[
            pl.BlockSpec((tb, 1),    lambda i: (i, 0)),   # t tile
            pl.BlockSpec((tp, np_),  lambda i: (0, 0)),   # table@W1+b1 (resident)
            pl.BlockSpec((np_, np_), lambda i: (0, 0)),   # W2 (resident)
            pl.BlockSpec((1, np_),   lambda i: (0, 0)),   # b2
        ],
        out_specs=pl.BlockSpec((tb, np_), lambda i: (i, 0)),
    )

    out_p = pl.pallas_call(
        time_embedding_kernel,
        grid_spec=grid_spec,
        out_shape=jax.ShapeDtypeStruct((bp, np_), out_dtype),
        compiler_params=pltpu.CompilerParams(
            dimension_semantics=("parallel",),     # batch rows split across TCs (v7x)
            vmem_limit_bytes=vmem_limit,
        ),
    )(t_p, tw1_p, w2_p, b2_p)

    return out_p[:B, :dim]


# ------------------------ parameter / table setup ----------------------------

def make_time_matrix(T: int, d_model: int) -> jnp.ndarray:
    """Sinusoidal embedding table, matching the PyTorch construction."""
    position = jnp.arange(T, dtype=jnp.float32)[:, None]                 # (T, 1)
    ratio = jnp.exp(jnp.arange(0, d_model, 2, dtype=jnp.float32)
                    * (-math.log(10000.0) / d_model))                    # (d_model/2,)
    sin = jnp.sin(position * ratio)
    cos = jnp.cos(position * ratio)
    # even columns = sin, odd columns = cos
    return jnp.stack([sin, cos], axis=-1).reshape(T, d_model)


def init_linear(key, fan_in: int, fan_out: int):
    """PyTorch nn.Linear default init (uniform ±1/sqrt(fan_in)), deterministic."""
    kw, kb = jax.random.split(key)
    bound = 1.0 / math.sqrt(fan_in)
    # stored as (fan_in, fan_out) so forward is x @ W + b  (== PyTorch x @ W.T)
    w = jax.random.uniform(kw, (fan_in, fan_out), jnp.float32, -bound, bound)
    b = jax.random.uniform(kb, (fan_out,), jnp.float32, -bound, bound)
    return w, b


# --------------------------------- main ---------------------------------------

if __name__ == "__main__":
    # UNet(t=T, ch=32, ...): TimeEmbedding(T, d_model=ch, dim=4*ch)
    T, ch = 16, 32
    d_model, dim = ch, 4 * ch
    B = 8

    key = jax.random.PRNGKey(0)
    k_t, k_l1, k_l2 = jax.random.split(key, 3)

    time_matrix = make_time_matrix(T, d_model)            # (T, d_model)
    w1, b1 = init_linear(k_l1, d_model, dim)              # Linear(d_model, dim)
    w2, b2 = init_linear(k_l2, dim, dim)                  # Linear(dim, dim)
    t = jax.random.randint(k_t, (B,), 0, T, dtype=jnp.int32)

    out = time_embedding_forward(t, time_matrix, w1, b1, w2, b2)
    out = jax.block_until_ready(out)

    # Pure-f32 JAX reference (exact PyTorch semantics).
    emb = time_matrix[t]
    h = emb @ w1 + b1
    h = h * jax.nn.sigmoid(h)
    ref = h @ w2 + b2

    assert out.shape == (B, dim), out.shape
    assert jnp.allclose(out, ref, atol=1e-2, rtol=1e-2), \
        float(jnp.max(jnp.abs(out - ref)))

    print("KERNEL_OK")
</pallas_src>

<mosaic_0001>
module attributes {stable_mosaic.version = 11 : i64} {
  func.func @time_embedding_kernel(%arg0: i32, %arg1: memref<8x1xi32, #tpu.memory_space<vmem>>, %arg2: memref<128x128xf32, #tpu.memory_space<vmem>>, %arg3: memref<128x128xf32, #tpu.memory_space<vmem>>, %arg4: memref<1x128xf32, #tpu.memory_space<vmem>>, %arg5: memref<8x128xf32, #tpu.memory_space<vmem>>) attributes {dimension_semantics = [#tpu.dimension_semantics<parallel>], iteration_bounds = array<i64: 1>, scalar_prefetch = 0 : i64, scratch_operands = 0 : i64, tpu.core_type = #tpu.core_type<tc>, window_params = [{transform_indices = @transform_0, window_bounds = array<i64: 8, 1>}, {pipeline_mode = #tpu.pipeline_mode<synchronous>, transform_indices = @transform_1, window_bounds = array<i64: 128, 128>}, {pipeline_mode = #tpu.pipeline_mode<synchronous>, transform_indices = @transform_2, window_bounds = array<i64: 128, 128>}, {pipeline_mode = #tpu.pipeline_mode<synchronous>, transform_indices = @transform_3, window_bounds = array<i64: 1, 128>}, {transform_indices = @transform_4, window_bounds = array<i64: 8, 128>}]} {
    %0 = tpu.iota {dimensions = array<i32: 1>} : vector<8x128xi32>
    %c0 = arith.constant 0 : index
    %c0_0 = arith.constant 0 : index
    %1 = vector.load %arg1[%c0, %c0_0] : memref<8x1xi32, #tpu.memory_space<vmem>>, vector<8x1xi32>
    %2 = vector.broadcast %1 : vector<8x1xi32> to vector<8x128xi32>
    %3 = arith.cmpi eq, %0, %2 : vector<8x128xi32>
    %4 = arith.extui %3 : vector<8x128xi1> to vector<8x128xi32>
    %5 = arith.sitofp %4 : vector<8x128xi32> to vector<8x128xf32>
    %c0_1 = arith.constant 0 : index
    %c0_2 = arith.constant 0 : index
    %6 = vector.load %arg2[%c0_1, %c0_2] : memref<128x128xf32, #tpu.memory_space<vmem>>, vector<128x128xf32>
    %cst = arith.constant dense<0.000000e+00> : vector<8x128xf32>
    %7 = tpu.matmul %5, %6, %cst {dimension_numbers = #tpu.dot_dimension_numbers<[1], [0], [0], [1], [0, 0, 1, 1], [], []>} : vector<8x128xf32>, vector<128x128xf32>, vector<8x128xf32> -> vector<8x128xf32>
    %8 = arith.negf %7 : vector<8x128xf32>
    %9 = math.exp %8 : vector<8x128xf32>
    %cst_3 = arith.constant 1.000000e+00 : f32
    %10 = vector.broadcast %cst_3 : f32 to vector<8x128xf32>
    %11 = arith.addf %10, %9 : vector<8x128xf32>
    %12 = arith.divf %10, %11 : vector<8x128xf32>
    %13 = arith.mulf %7, %12 : vector<8x128xf32>
    %c0_4 = arith.constant 0 : index
    %c0_5 = arith.constant 0 : index
    %14 = vector.load %arg3[%c0_4, %c0_5] : memref<128x128xf32, #tpu.memory_space<vmem>>, vector<128x128xf32>
    %cst_6 = arith.constant dense<0.000000e+00> : vector<8x128xf32>
    %15 = tpu.matmul %13, %14, %cst_6 {dimension_numbers = #tpu.dot_dimension_numbers<[1], [0], [0], [1], [0, 0, 1, 1], [], []>} : vector<8x128xf32>, vector<128x128xf32>, vector<8x128xf32> -> vector<8x128xf32>
    %c0_7 = arith.constant 0 : index
    %c0_8 = arith.constant 0 : index
    %16 = vector.load %arg4[%c0_7, %c0_8] : memref<1x128xf32, #tpu.memory_space<vmem>>, vector<1x128xf32>
    %17 = vector.broadcast %16 : vector<1x128xf32> to vector<8x128xf32>
    %18 = arith.addf %15, %17 : vector<8x128xf32>
    %c0_9 = arith.constant 0 : index
    %c0_10 = arith.constant 0 : index
    %19 = vector.load %arg5[%c0_9, %c0_10] : memref<8x128xf32, #tpu.memory_space<vmem>>, vector<8x128xf32>
    tpu.vector_store %arg5[%c0_9, %c0_10], %18 {strides = array<i32>} : memref<8x128xf32, #tpu.memory_space<vmem>>, vector<8x128xf32>,
    return
  }
  func.func @transform_0(%arg0: i32) -> (i32, i32) {
    %c0_i32 = arith.constant 0 : i32
    %c0_i32_0 = arith.constant 0 : i32
    return %arg0, %c0_i32 : i32, i32
  }
  func.func @transform_1(%arg0: i32) -> (i32, i32) {
    %c0_i32 = arith.constant 0 : i32
    %c0_i32_0 = arith.constant 0 : i32
    %c0_i32_1 = arith.constant 0 : i32
    return %c0_i32, %c0_i32_0 : i32, i32
  }
  func.func @transform_2(%arg0: i32) -> (i32, i32) {
    %c0_i32 = arith.constant 0 : i32
    %c0_i32_0 = arith.constant 0 : i32
    %c0_i32_1 = arith.constant 0 : i32
    return %c0_i32, %c0_i32_0 : i32, i32
  }
  func.func @transform_3(%arg0: i32) -> (i32, i32) {
    %c0_i32 = arith.constant 0 : i32
    %c0_i32_0 = arith.constant 0 : i32
    %c0_i32_1 = arith.constant 0 : i32
    return %c0_i32, %c0_i32_0 : i32, i32
  }
  func.func @transform_4(%arg0: i32) -> (i32, i32) {
    %c0_i32 = arith.constant 0 : i32
    %c0_i32_0 = arith.constant 0 : i32
    return %arg0, %c0_i32 : i32, i32
  }
}

</mosaic_0001>

<bundles_post_ra>
// kernel: tpu_custom_call.1
= control target key start
LH: loop header
LB: loop body
LE: loop exit
PB: predicated region body
PF: predicated region fallthrough
CT: control target
= control target key end

     0   :  { %9 = vsyncpa [#allocation3], 0  ;;  %s594_s0 = inlined_call_operand.vmem [shape: s32[8,1], index: 0, kind: input, shape index: {}]   ;;  %s595_s1 = inlined_call_operand.hbm [shape: f32[128,128], index: 1, kind: input, shape index: {}]   ;;  %s596_s2 = inlined_call_operand.hbm [shape: f32[128,128], index: 2, kind: input, shape index: {}]   ;;  %s597_s3 = inlined_call_operand.vmem [shape: f32[1,128], index: 3, kind: input, shape index: {}]   ;;  %s598_s4 = inlined_call_operand.hbm [shape: f32[8,128], index: 4, kind: output, shape index: {}]  }
   0x1   :  { %10 = vsyncpa [#allocation6], 0 }
   0x2   :  { %11 = vsyncpa [#allocation4], 0  ;;  %s501_s15 = smov [#allocation2]   ;;  %s429_s19 = scalar_lea.hbm %s595_s1, 2048 }
   0x3   :  { %s19_s16 = sshll.u32 %s501_s15, 4  ;;  %p430_p0 = scmp.ne.s32.totalorder %s595_s1, %s429_s19  ;;  %s20_s16 = int_to_ptr.vmem [resolvable:$true] %s19_s16 }
   0x4   :  { %p433_p1 = scmp.lt.u32.totalorder %s429_s19, %s595_s1 }
   0x6   :  { %p435_p2 = pnand %p433_p1, %p430_p0 }
   0x8   :  { %438 = shalt.err (!%p435_p2)
}
   0x9   :  { %s439_s24 = scalar_lea.vmem %s20_s16, 2048  ;;  %p444_p4 = scmp.lt.s32.totalorder %s20_s16, %s20_s16 }
   0xa   :  { %p440_p3 = scmp.ne.s32.totalorder %s20_s16, %s439_s24  ;;  %p445_p5 = scmp.lt.s32.totalorder %s439_s24, %s439_s24 }
   0xc   :  { %p446_p6 = por %p445_p5, %p444_p4 }
   0xe   :  { %p447_p7 = pnand %p446_p6, %p440_p3 }
  0x10   :  { %450 = shalt.err (!%p447_p7)
}
  0x11   :  { %s502_s25 = smov 128   ;;  %s503_s26 = smov 8  }
  0x12   :  { %25 = dma.hbm_to_vmem [thread:$0]  %s595_s1, 2048, %s20_s16, [#allocation3], %s502_s25, %s502_s25, %s503_s26  }
  0x13   :  { %s504_s29 = smov [#allocation5]   ;;  %s451_s7 = scalar_lea.hbm %s596_s2, 2048 }
  0x14   :  { %s31_s30 = sshll.u32 %s504_s29, 4  ;;  %p452_p8 = scmp.ne.s32.totalorder %s596_s2, %s451_s7  ;;  %s32_s30 = int_to_ptr.vmem [resolvable:$true] %s31_s30 }
  0x15   :  { %p455_p9 = scmp.lt.u32.totalorder %s451_s7, %s596_s2 }
  0x17   :  { %p457_p10 = pnand %p455_p9, %p452_p8 }
  0x19   :  { %460 = shalt.err (!%p457_p10)
}
  0x1a   :  { %s461_s12 = scalar_lea.vmem %s32_s30, 2048  ;;  %p466_p12 = scmp.lt.s32.totalorder %s32_s30, %s32_s30 }
  0x1b   :  { %p462_p11 = scmp.ne.s32.totalorder %s32_s30, %s461_s12  ;;  %p467_p13 = scmp.lt.s32.totalorder %s461_s12, %s461_s12 }
  0x1d   :  { %p468_p0 = por %p467_p13, %p466_p12 }
  0x1f   :  { %p469_p1 = pnand %p468_p0, %p462_p11 }
  0x21   :  { %472 = shalt.err (!%p469_p1)
}
  0x22   :  { %37 = dma.hbm_to_vmem [thread:$0]  %s596_s2, 2048, %s32_s30, [#allocation6], %s502_s25, %s502_s25, %s503_s26  }
  0x23   :  { %495 = dma.done.wait [#allocation3], 2048  }
  0x24   :  { %496 = vsyncadd [#allocation3], 4294965248 }
  0x25   :  { %497 = dma.done.wait [#allocation6], 2048  }
  0x26   :  { %498 = vsyncadd [#allocation6], 4294965248  ;;  %v505_v0 = vmov 0   ;;  %v506_v1 = vmov 0.0|0.0   ;;  %v48_v2 = vld [vmem:[%s594_s0] sm:$0xff]  ;;  %v55_v3 = vld [vmem:[#allocation2] sm:$0xff]  ;;  %v46_v31 = vlaneseq }
  0x27   :  { %424 = vset.pattern.permute.xlu0 %v505_v0  ;;  %366 = vmatprep.subr.bf16.mxu0 %v506_v1  ;;  %v56_v4 = vld [vmem:[#allocation2 + $0x8] sm:$0xff]  ;;  %v57_v6 = vld [vmem:[#allocation2 + $0x10] sm:$0xff]  ;;  %v58_v7 = vld [vmem:[#allocation2 + $0x18] sm:$0xff]  ;;  %vm507_vm0 = vmmov 0   ;;  %v508_v8 = vmov 0.0   ;;  %v509_v34 = vmov 1.0  }
  0x28   :  { %390 = vmatprep.subr.bf16.mxu1 %v506_v1  ;;  %50 = vperm.xlu0 %424, %v48_v2   ;;  %v367_v5 = vpack.c.bf16 %v56_v4, %v55_v3  ;;  %v370_v9 = vpack.c.bf16 %v58_v7, %v57_v6  ;;  %v59_v10 = vld [vmem:[#allocation2 + $0x20] sm:$0xff]  ;;  %v60_v11 = vld [vmem:[#allocation2 + $0x28] sm:$0xff]  ;;  %v61_v16 = vld [vmem:[#allocation2 + $0x30] sm:$0xff]  ;;  %v47_v32 = vand.u32 127, %v46_v31  ;;  %s510_s16 = smov [#allocation7]  }
  0x29   :  { %328 = vmatprep.mubr.msk.f32.mxu0 %vm507_vm0, %v508_v8  ;;  %363 = vmatprep.mubr.msk.f32.mxu1 %vm507_vm0, %v508_v8  ;;  %v148_v12 = vld [vmem:[#allocation5] sm:$0xff]  ;;  %v149_v13 = vld [vmem:[#allocation5 + $0x8] sm:$0xff]  ;;  %v373_v14 = vpack.c.bf16 %v60_v11, %v59_v10  ;;  %v62_v17 = vld [vmem:[#allocation2 + $0x38] sm:$0xff]  ;;  %s248_s17 = sshll.u32 %s510_s16, 4  ;;  %s249_s17 = int_to_ptr.vmem [resolvable:$true] %s248_s17 }
  0x2a   :  { %368 = vmatpush3.bf16.msra.mxu0 %v367_v5  ;;  %v391_v15 = vpack.c.bf16 %v149_v13, %v148_v12  ;;  %v376_v18 = vpack.c.bf16 %v62_v17, %v61_v16  ;;  %v63_v19 = vld [vmem:[#allocation2 + $0x40] sm:$0xff]  ;;  %v64_v20 = vld [vmem:[#allocation2 + $0x48] sm:$0xff]  ;;  %v65_v22 = vld [vmem:[#allocation2 + $0x50] sm:$0xff]  ;;  %s473_s18 = scalar_lea.vmem %s249_s17, 128  ;;  %p478_p3 = scmp.lt.s32.totalorder %s249_s17, %s249_s17 }
  0x2b   :  { %369 = vmatprep.subr.bf16.mxu0 %v506_v1  ;;  %v379_v21 = vpack.c.bf16 %v64_v20, %v63_v19  ;;  %v66_v23 = vld [vmem:[#allocation2 + $0x58] sm:$0xff]  ;;  %v67_v25 = vld [vmem:[#allocation2 + $0x60] sm:$0xff]  ;;  %v68_v26 = vld [vmem:[#allocation2 + $0x68] sm:$0xff]  ;;  %p474_p2 = scmp.ne.s32.totalorder %s249_s17, %s473_s18  ;;  %p479_p4 = scmp.lt.s32.totalorder %s473_s18, %s473_s18 }
  0x2c   :  { %392 = vmatpush3.bf16.msra.mxu1 %v391_v15  ;;  %v382_v24 = vpack.c.bf16 %v66_v23, %v65_v22  ;;  %v385_v27 = vpack.c.bf16 %v68_v26, %v67_v25  ;;  %v69_v28 = vld [vmem:[#allocation2 + $0x70] sm:$0xff]  ;;  %v70_v29 = vld [vmem:[#allocation2 + $0x78] sm:$0xff]  ;;  %v152_v38 = vld [vmem:[#allocation5 + $0x20] sm:$0xff] }
  0x2d   :  { %393 = vmatprep.subr.bf16.mxu1 %v506_v1  ;;  %v388_v30 = vpack.c.bf16 %v70_v29, %v69_v28  ;;  %v150_v35 = vld [vmem:[#allocation5 + $0x10] sm:$0xff]  ;;  %v151_v36 = vld [vmem:[#allocation5 + $0x18] sm:$0xff]  ;;  %v153_v39 = vld [vmem:[#allocation5 + $0x28] sm:$0xff]  ;;  %p480_p5 = por %p479_p4, %p478_p3 }
  0x2e   :  { %371 = vmatpush3.bf16.msra.mxu0 %v370_v9  ;;  %v394_v37 = vpack.c.bf16 %v151_v36, %v150_v35  ;;  %v397_v40 = vpack.c.bf16 %v153_v39, %v152_v38  ;;  %v154_v41 = vld [vmem:[#allocation5 + $0x30] sm:$0xff]  ;;  %v155_v42 = vld [vmem:[#allocation5 + $0x38] sm:$0xff]  ;;  %v156_v44 = vld [vmem:[#allocation5 + $0x40] sm:$0xff] }
  0x2f   :  { %372 = vmatprep.subr.bf16.mxu0 %v506_v1  ;;  %v400_v43 = vpack.c.bf16 %v155_v42, %v154_v41  ;;  %v157_v45 = vld [vmem:[#allocation5 + $0x48] sm:$0xff]  ;;  %v158_v47 = vld [vmem:[#allocation5 + $0x50] sm:$0xff]  ;;  %v159_v48 = vld [vmem:[#allocation5 + $0x58] sm:$0xff]  ;;  %p481_p6 = pnand %p480_p5, %p474_p2 }
  0x30   :  { %395 = vmatpush3.bf16.msra.mxu1 %v394_v37  ;;  %v403_v46 = vpack.c.bf16 %v157_v45, %v156_v44  ;;  %v406_v49 = vpack.c.bf16 %v159_v48, %v158_v47  ;;  %v160_v50 = vld [vmem:[#allocation5 + $0x60] sm:$0xff]  ;;  %v161_v51 = vld [vmem:[#allocation5 + $0x68] sm:$0xff]  ;;  %v162_v53 = vld [vmem:[#allocation5 + $0x70] sm:$0xff] }
  0x31   :  { %396 = vmatprep.subr.bf16.mxu1 %v506_v1  ;;  %v409_v52 = vpack.c.bf16 %v161_v51, %v160_v50  ;;  %v163_v54 = vld [vmem:[#allocation5 + $0x78] sm:$0xff]  ;;  %v261_v63 = vld [vmem:[%s597_s3] ss:$0 sm:$0xff] }
  0x32   :  { %374 = vmatpush3.bf16.msra.mxu0 %v373_v14  ;;  %v412_v55 = vpack.c.bf16 %v163_v54, %v162_v53 }
  0x33   :  { %375 = vmatprep.subr.bf16.mxu0 %v506_v1 }
  0x34   :  { %398 = vmatpush3.bf16.msra.mxu1 %v397_v40 }
  0x35   :  { %399 = vmatprep.subr.bf16.mxu1 %v506_v1 }
  0x36   :  { %377 = vmatpush3.bf16.msra.mxu0 %v376_v18 }
  0x37   :  { %378 = vmatprep.subr.bf16.mxu0 %v506_v1 }
  0x38   :  { %401 = vmatpush3.bf16.msra.mxu1 %v400_v43 }
  0x39   :  { %402 = vmatprep.subr.bf16.mxu1 %v506_v1 }
  0x3a   :  { %380 = vmatpush3.bf16.msra.mxu0 %v379_v21 }
  0x3b   :  { %381 = vmatprep.subr.bf16.mxu0 %v506_v1 }
  0x3c   :  { %404 = vmatpush3.bf16.msra.mxu1 %v403_v46 }
  0x3d   :  { %405 = vmatprep.subr.bf16.mxu1 %v506_v1 }
  0x3e   :  { %383 = vmatpush3.bf16.msra.mxu0 %v382_v24 }
  0x3f   :  { %384 = vmatprep.subr.bf16.mxu0 %v506_v1 }
  0x40   :  { %407 = vmatpush3.bf16.msra.mxu1 %v406_v49 }
  0x41   :  { %408 = vmatprep.subr.bf16.mxu1 %v506_v1 }
  0x42   :  { %386 = vmatpush3.bf16.msra.mxu0 %v385_v27 }
  0x43   :  { %387 = vmatprep.subr.bf16.mxu0 %v506_v1 }
  0x44   :  { %410 = vmatpush3.bf16.msra.mxu1 %v409_v52 }
  0x45   :  { %411 = vmatprep.subr.bf16.mxu1 %v506_v1 }
  0x46   :  { %389 = vmatpush3.bf16.msra.mxu0 %v388_v30 }
  0x48   :  { %413 = vmatpush3.bf16.msra.mxu1 %v412_v55 }
  0xa7   :  { %v51_v33 = vpop.permute.xlu0 %50 }
  0xa8   :  { %vm52_vm1 = vcmp.eq.s32.totalorder %v47_v32, %v51_v33 }
  0xa9   :  { %329 = vmatmul.mubr.msk.f32.vlgmr.msra.gmra.mrb[0].mxu0 %vm52_vm1, %v509_v34 }
 0x17c   :  { %v137_v56 = vpop.f32.mrb[0].mxu0 }
 0x17d   :  { %v260_v57 = vmul.f32 -1.442695, %v137_v56  ;;  %v330_v58 = vpop.f32.mrb[1].mxu0 }
 0x17f   :  { %425 = vpow2.f32 %v260_v57 }
 0x189   :  { %v426_v59 = vpop.eup %425 }
 0x18a   :  { %v144_v60 = vadd.f32 1.0, %v426_v59 }
 0x18c   :  { %427 = vrcp.f32 %v144_v60 }
 0x196   :  { %v428_v61 = vpop.eup %427 }
 0x197   :  { %v147_v62 = vmul.f32 %v428_v61, %v137_v56 }
 0x199   :  { %364 = vmatmul.mubr.f32.vlgmr.msra.gmra.mrb[0].mxu1 %v147_v62 }
 0x26c   :  { %v237_v0 = vpop.f32.mrb[0].mxu1 }
 0x26d   :  { %v238_v1 = vadd.f32 %v261_v63, %v237_v0  ;;  %v365_v2 = vpop.f32.mrb[1].mxu1 }
 0x26f   :  { %241 = vst [vmem:[#allocation7] sm:$0xff] %v238_v1 }
 0x270   :  { %484 = shalt.err (!%p481_p6)
}
 0x271   :  { %s485_s21 = scalar_lea.hbm %s598_s4, 128 }
 0x272   :  { %p486_p7 = scmp.ne.s32.totalorder %s598_s4, %s485_s21  ;;  %p489_p8 = scmp.lt.u32.totalorder %s485_s21, %s598_s4 }
 0x274   :  { %p491_p9 = pnand %p489_p8, %p486_p7 }
 0x276   :  { %494 = shalt.err (!%p491_p9)
}
 0x277   :  { %251 = dma.vmem_to_hbm [thread:$0]  %s249_s17, 128, %s598_s4, [#allocation4]  }
 0x278   :  { %499 = dma.done.wait [#allocation4], 128  }
 0x279   :  { %500 = vsyncadd [#allocation4], 4294967168 }
 0x27a   :  { %255 = vsyncpa [#allocation3], 1 }
 0x27b   :  { %256 = vsyncpa [#allocation6], 1 }
 0x27c   :  { %257 = vsyncpa [#allocation4], 1 }

</bundles_post_ra>
